<compile_context>
chip_gen: v7x
topology: tpu7x:2x2x1
jax: 0.10.0
libtpu: 0.0.40
codegen_flags: <defaults>
</compile_context>

<pallas_src>
import functools

import jax
import jax.numpy as jnp
from jax import lax
from jax.experimental import pallas as pl
from jax.experimental.pallas import tpu as pltpu

_LANE = 128
_CHUNK_ROWS = 512  # inner fori_loop chunk: 512*128*4 B = 256 KiB per input


def _cdiv(a, b):
    return (a + b - 1) // b


def _round_up(x, m):
    return ((x + m - 1) // m) * m


def _device_kind():
    try:
        return jax.devices()[0].device_kind.lower()
    except Exception:
        return ""


def _int_pow(x, p):
    """x**p, strength-reduced to multiplies when p is a small non-negative int."""
    ip = int(p)
    if float(ip) == float(p) and 0 <= ip <= 8:
        if ip == 0:
            return jnp.ones_like(x)
        result, base, e = None, x, ip
        while e:
            if e & 1:
                result = base if result is None else result * base
            e >>= 1
            if e:
                base = base * base
        return result
    return jnp.power(x, p)


def _elem_contrib(pred, gt, alpha, gamma, eps):
    """Per-element focal contribution and positive indicator (both f32).

    Single-log formulation:
      contrib = log(where(gt==1, pred, 1-pred) + eps)
                * where(gt==1, (1-pred)^alpha,
                        where(gt<1, pred^alpha*(1-gt)^gamma, 0))
    Selects (not multiplies) are used so garbage / out-of-range lanes never
    inject NaN/inf into the accumulators.
    """
    is_pos = gt == 1.0
    one_m_pred = 1.0 - pred
    log_arg = jnp.where(is_pos, pred, one_m_pred)
    if eps:
        log_arg = log_arg + eps
    logv = jnp.log(log_arg)
    pos_w = _int_pow(one_m_pred, alpha)
    neg_w = _int_pow(pred, alpha) * _int_pow(1.0 - gt, gamma)
    w = jnp.where(is_pos, pos_w, jnp.where(gt < 1.0, neg_w, 0.0))
    contrib = logv * w
    pos = is_pos.astype(jnp.float32)
    return contrib, pos


def _gfl_kernel(pred_ref, gt_ref, acc_ref, *, alpha, gamma, eps, rows_valid,
                block_rows, chunk, blocks_total, blocks_per_core, num_cores):
    c = pl.program_id(0)   # core / parallel axis
    j = pl.program_id(1)   # sequential block axis

    # Zero the per-core vector accumulators at the start of each core's sweep.
    @pl.when(j == 0)
    def _():
        acc_ref[...] = jnp.zeros_like(acc_ref)

    flat_block = c * blocks_per_core + j

    def accum(r0, n_rows, carry, masked):
        loss_acc, pos_acc = carry
        p = pred_ref[pl.ds(r0, n_rows), :].astype(jnp.float32)
        g = gt_ref[pl.ds(r0, n_rows), :].astype(jnp.float32)
        contrib, pos = _elem_contrib(p, g, alpha, gamma, eps)
        if masked:
            row = (flat_block * block_rows + r0
                   + lax.broadcasted_iota(jnp.int32, p.shape, 0))
            valid = row < rows_valid
            contrib = jnp.where(valid, contrib, 0.0)
            pos = jnp.where(valid, pos, 0.0)
        # VPU-only fold: (n_rows,128) -> (8,128) register accumulators.
        loss_acc = loss_acc + contrib.reshape(-1, 8, _LANE).sum(axis=0)
        pos_acc = pos_acc + pos.reshape(-1, 8, _LANE).sum(axis=0)
        return loss_acc, pos_acc

    def run_block(masked):
        zero = jnp.zeros((8, _LANE), jnp.float32)
        carry = (zero, zero)
        n_full = block_rows // chunk
        rem_rows = block_rows - n_full * chunk
        if n_full > 1:
            def body(i, carry):
                r0 = pl.multiple_of(i * chunk, chunk)
                return accum(r0, chunk, carry, masked)
            carry = lax.fori_loop(0, n_full, body, carry)
        elif n_full == 1:
            carry = accum(0, chunk, carry, masked)
        if rem_rows:
            carry = accum(n_full * chunk, rem_rows, carry, masked)
        loss_acc, pos_acc = carry
        acc_ref[0, 0] += loss_acc
        acc_ref[0, 1] += pos_acc

    has_ragged_tail = (rows_valid % block_rows) != 0       # trace-time bool
    has_dup_blocks = (num_cores * blocks_per_core) != blocks_total

    if not has_ragged_tail and not has_dup_blocks:
        # Fast path for the whole grid: no masking, no validity guard.
        run_block(masked=False)
    else:
        is_tail = flat_block == (blocks_total - 1)
        in_range = flat_block < blocks_total
        if has_ragged_tail:
            fast = jnp.logical_not(is_tail)
            tail = is_tail
            if has_dup_blocks:
                fast = jnp.logical_and(in_range, fast)
                tail = jnp.logical_and(in_range, tail)
            pl.when(fast)(lambda: run_block(masked=False))
            pl.when(tail)(lambda: run_block(masked=True))
        else:
            pl.when(in_range)(lambda: run_block(masked=False))


def gaussian_focal_loss(pred, gt, alpha=2.0, gamma=4.0, loss_weight=1.0,
                        eps=0.0):
    """Pallas TPU implementation of GaussianFocalLoss.forward(pred, gt).

    eps defaults to 0.0 to match the reference module exactly.
    # TODO(synk): mmdet's GaussianFocalLoss adds eps=1e-12 inside the logs to
    # guard against predictions saturated to exactly 0/1; pass eps=1e-12 here
    # if that behaviour is wanted.
    """
    assert pred.shape == gt.shape
    total = pred.size

    pred_f = pred.reshape(-1)
    gt_f = gt.reshape(-1)

    rows = total // _LANE
    rem = total - rows * _LANE

    loss_sum = jnp.zeros((), jnp.float32)
    num_pos = jnp.zeros((), jnp.float32)

    if rem:
        # <=127-element ragged tail handled in plain JAX (tiny); avoids the
        # full-array jnp.pad copy the previous version made.
        c_t, p_t = _elem_contrib(pred_f[rows * _LANE:].astype(jnp.float32),
                                 gt_f[rows * _LANE:].astype(jnp.float32),
                                 float(alpha), float(gamma), float(eps))
        loss_sum = loss_sum + jnp.sum(c_t)
        num_pos = num_pos + jnp.sum(p_t)

    if rows > 0:
        if rem:
            # TODO(synk): XLA may materialize this prefix slice; it is only
            # taken when total % 128 != 0 (otherwise the reshape below is free).
            pred_m = pred_f[: rows * _LANE]
            gt_m = gt_f[: rows * _LANE]
        else:
            pred_m, gt_m = pred_f, gt_f
        pred2 = pred_m.reshape(rows, _LANE)   # native dtype, no wrapper cast
        gt2 = gt_m.reshape(rows, _LANE)

        kind = _device_kind()
        is_v7 = ("v7" in kind) or ("tpu7" in kind)
        is_v5e = ("v5 lite" in kind) or ("v5e" in kind)

        # Sublane granularity that is tile-aligned for either input dtype.
        def _sub(dt):
            return 8 * max(1, 4 // jnp.dtype(dt).itemsize)

        sub = max(_sub(pred2.dtype), _sub(gt2.dtype))
        max_rows = 4096 if is_v5e else 8192   # 2 MiB vs 4 MiB f32 per input block
        block_rows = min(max_rows, _round_up(rows, sub))
        chunk = _CHUNK_ROWS if block_rows >= _CHUNK_ROWS else block_rows

        blocks_total = _cdiv(rows, block_rows)
        # 2 TensorCores only on v7x; single-TC parts keep a trivial leading axis.
        num_cores = 2 if (is_v7 and blocks_total >= 2) else 1
        blocks_per_core = _cdiv(blocks_total, num_cores)
        clamp = (num_cores * blocks_per_core) != blocks_total

        def in_map(c, j):
            b = c * blocks_per_core + j
            if clamp:
                # Duplicate tail mapping is skipped inside the kernel.
                b = jnp.minimum(b, blocks_total - 1)
            return (b, 0)

        in_spec = pl.BlockSpec((block_rows, _LANE), in_map)
        out_spec = pl.BlockSpec((1, 2, 8, _LANE), lambda c, j: (c, 0, 0, 0))

        blk_bytes = block_rows * _LANE * (pred2.dtype.itemsize
                                          + gt2.dtype.itemsize)
        vmem_limit = int(min(64 << 20, 2 * blk_bytes + (16 << 20)))

        kernel = functools.partial(
            _gfl_kernel, alpha=float(alpha), gamma=float(gamma),
            eps=float(eps), rows_valid=rows, block_rows=block_rows,
            chunk=chunk, blocks_total=blocks_total,
            blocks_per_core=blocks_per_core, num_cores=num_cores)

        acc = pl.pallas_call(
            kernel,
            out_shape=jax.ShapeDtypeStruct((num_cores, 2, 8, _LANE),
                                           jnp.float32),
            grid_spec=pltpu.PrefetchScalarGridSpec(
                num_scalar_prefetch=0,
                grid=(num_cores, blocks_per_core),
                in_specs=[in_spec, in_spec],
                out_specs=out_spec,
            ),
            compiler_params=pltpu.CompilerParams(
                dimension_semantics=("parallel", "arbitrary"),
                vmem_limit_bytes=vmem_limit),
        )(pred2, gt2)

        # Tiny final tree-reduce (<= 2*2*8*128 floats) + scalar epilogue.
        loss_sum = loss_sum + jnp.sum(acc[:, 0])
        num_pos = num_pos + jnp.sum(acc[:, 1])

    # When num_pos == 0 the pos-loss sum is identically 0, so dividing by the
    # clamped denominator reproduces the reference's `-neg_loss` branch.
    loss = -loss_sum / jnp.maximum(num_pos, 1.0)
    return loss_weight * loss


def _reference(pred, gt, alpha=2.0, gamma=4.0, loss_weight=1.0):
    pred = pred.astype(jnp.float32)
    gt = gt.astype(jnp.float32)
    pos_inds = (gt == 1.0).astype(jnp.float32)
    neg_inds = (gt < 1.0).astype(jnp.float32)
    neg_weights = jnp.power(1.0 - gt, gamma)
    pos_loss = jnp.log(pred) * jnp.power(1.0 - pred, alpha) * pos_inds
    neg_loss = jnp.log(1.0 - pred) * jnp.power(pred, alpha) * neg_weights * neg_inds
    num_pos = pos_inds.sum()
    pos_loss = pos_loss.sum()
    neg_loss = neg_loss.sum()
    loss = jnp.where(num_pos == 0.0, -neg_loss,
                     -(pos_loss + neg_loss) / jnp.where(num_pos == 0.0, 1.0, num_pos))
    return loss_weight * loss


if __name__ == "__main__":
    key = jax.random.PRNGKey(0)
    k1, k2, k3 = jax.random.split(key, 3)

    B, C, H, W = 2, 4, 16, 16  # NCHW, same convention as the PyTorch module
    # predictions: sigmoid outputs strictly in (0, 1)
    pred = jax.nn.sigmoid(jax.random.normal(k1, (B, C, H, W), jnp.float32))
    # ground-truth gaussian heatmap in [0, 1) with some exact 1.0 peaks
    gt = jax.random.uniform(k2, (B, C, H, W), jnp.float32, 0.0, 0.999)
    peak_mask = jax.random.bernoulli(k3, 0.01, (B, C, H, W))
    gt = jnp.where(peak_mask, 1.0, gt)

    loss = gaussian_focal_loss(pred, gt, alpha=2.0, gamma=4.0, loss_weight=1.0)
    loss = jax.block_until_ready(loss)

    ref = _reference(pred, gt, alpha=2.0, gamma=4.0, loss_weight=1.0)
    assert jnp.allclose(loss, ref, rtol=1e-5, atol=1e-5), (loss, ref)

    # also exercise the num_pos == 0 branch
    gt0 = jnp.clip(gt, 0.0, 0.9)
    loss0 = jax.block_until_ready(gaussian_focal_loss(pred, gt0))
    ref0 = _reference(pred, gt0)
    assert jnp.allclose(loss0, ref0, rtol=1e-5, atol=1e-5), (loss0, ref0)

    # exercise the no-pad ragged path (total % 128 != 0) + in-kernel row masking
    P, Q = 3, 5
    pred_big = jax.nn.sigmoid(jax.random.normal(k1, (P, 7, 33, Q * 13), jnp.float32))
    gt_big = jax.random.uniform(k2, pred_big.shape, jnp.float32, 0.0, 0.999)
    gt_big = jnp.where(jax.random.bernoulli(k3, 0.005, pred_big.shape), 1.0, gt_big)
    loss_big = jax.block_until_ready(gaussian_focal_loss(pred_big, gt_big))
    ref_big = _reference(pred_big, gt_big)
    assert jnp.allclose(loss_big, ref_big, rtol=1e-5, atol=1e-5), (loss_big, ref_big)

    print("KERNEL_OK")
</pallas_src>

<mosaic_0001>
module attributes {stable_mosaic.version = 11 : i64} {
  func.func @_gfl_kernel(%arg0: i32, %arg1: i32, %arg2: memref<16x128xf32, #tpu.memory_space<vmem>>, %arg3: memref<16x128xf32, #tpu.memory_space<vmem>>, %arg4: memref<1x2x8x128xf32, #tpu.memory_space<vmem>>) attributes {dimension_semantics = [#tpu.dimension_semantics<parallel>, #tpu.dimension_semantics<arbitrary>], iteration_bounds = array<i64: 1, 1>, scalar_prefetch = 0 : i64, scratch_operands = 0 : i64, tpu.core_type = #tpu.core_type<tc>, window_params = [{transform_indices = @transform_0, window_bounds = array<i64: 16, 128>}, {transform_indices = @transform_1, window_bounds = array<i64: 16, 128>}, {transform_indices = @transform_2, window_bounds = array<i64: 1, 2, 8, 128>}]} {
    %c0_i32 = arith.constant 0 : i32
    %0 = arith.cmpi eq, %arg1, %c0_i32 : i32
    %1 = arith.extui %0 : i1 to i32
    %c0_i32_0 = arith.constant 0 : i32
    %2 = arith.cmpi ne, %1, %c0_i32_0 : i32
    scf.if %2 {
      %cst_26 = arith.constant 0.000000e+00 : f32
      %45 = vector.broadcast %cst_26 : f32 to vector<1x2x8x128xf32>
      %c0_27 = arith.constant 0 : index
      %c0_28 = arith.constant 0 : index
      %c0_29 = arith.constant 0 : index
      %c0_30 = arith.constant 0 : index
      %46 = vector.load %arg4[%c0_27, %c0_28, %c0_29, %c0_30] : memref<1x2x8x128xf32, #tpu.memory_space<vmem>>, vector<1x2x8x128xf32>
      tpu.vector_store %arg4[%c0_27, %c0_28, %c0_29, %c0_30], %45 {strides = array<i32>} : memref<1x2x8x128xf32, #tpu.memory_space<vmem>>, vector<1x2x8x128xf32>,
    } else {
    }
    %cst = arith.constant 0.000000e+00 : f32
    %3 = vector.broadcast %cst : f32 to vector<8x128xf32>
    %c0 = arith.constant 0 : index
    %c0_1 = arith.constant 0 : index
    %4 = vector.load %arg2[%c0, %c0_1] : memref<16x128xf32, #tpu.memory_space<vmem>>, vector<16x128xf32>
    %c0_2 = arith.constant 0 : index
    %c0_3 = arith.constant 0 : index
    %5 = vector.load %arg3[%c0_2, %c0_3] : memref<16x128xf32, #tpu.memory_space<vmem>>, vector<16x128xf32>
    %cst_4 = arith.constant 1.000000e+00 : f32
    %6 = vector.broadcast %cst_4 : f32 to vector<16x128xf32>
    %7 = arith.cmpf oeq, %5, %6 : vector<16x128xf32>
    %cst_5 = arith.constant 1.000000e+00 : f32
    %8 = vector.broadcast %cst_5 : f32 to vector<16x128xf32>
    %9 = arith.subf %8, %4 : vector<16x128xf32>
    %10 = arith.select %7, %4, %9 : vector<16x128xi1>, vector<16x128xf32>
    %11 = math.log %10 : vector<16x128xf32>
    %12 = arith.mulf %9, %9 : vector<16x128xf32>
    %13 = arith.mulf %4, %4 : vector<16x128xf32>
    %cst_6 = arith.constant 1.000000e+00 : f32
    %14 = vector.broadcast %cst_6 : f32 to vector<16x128xf32>
    %15 = arith.subf %14, %5 : vector<16x128xf32>
    %16 = arith.mulf %15, %15 : vector<16x128xf32>
    %17 = arith.mulf %16, %16 : vector<16x128xf32>
    %18 = arith.mulf %13, %17 : vector<16x128xf32>
    %cst_7 = arith.constant 1.000000e+00 : f32
    %19 = vector.broadcast %cst_7 : f32 to vector<16x128xf32>
    %20 = arith.cmpf olt, %5, %19 : vector<16x128xf32>
    %cst_8 = arith.constant 0.000000e+00 : f32
    %21 = vector.broadcast %cst_8 : f32 to vector<16x128xf32>
    %22 = arith.select %20, %18, %21 : vector<16x128xi1>, vector<16x128xf32>
    %23 = arith.select %7, %12, %22 : vector<16x128xi1>, vector<16x128xf32>
    %24 = arith.mulf %11, %23 : vector<16x128xf32>
    %25 = arith.extui %7 : vector<16x128xi1> to vector<16x128xi32>
    %26 = arith.sitofp %25 : vector<16x128xi32> to vector<16x128xf32>
    %27 = vector.shape_cast %24 : vector<16x128xf32> to vector<2x8x128xf32>
    %cst_9 = arith.constant dense<0.000000e+00> : vector<8x128xf32>
    %28 = vector.multi_reduction <add>, %27, %cst_9 [0] : vector<2x8x128xf32> to vector<8x128xf32>
    %29 = arith.addf %3, %28 : vector<8x128xf32>
    %30 = vector.shape_cast %26 : vector<16x128xf32> to vector<2x8x128xf32>
    %cst_10 = arith.constant dense<0.000000e+00> : vector<8x128xf32>
    %31 = vector.multi_reduction <add>, %30, %cst_10 [0] : vector<2x8x128xf32> to vector<8x128xf32>
    %32 = arith.addf %3, %31 : vector<8x128xf32>
    %c0_11 = arith.constant 0 : index
    %c0_12 = arith.constant 0 : index
    %c0_13 = arith.constant 0 : index
    %c0_14 = arith.constant 0 : index
    %33 = vector.load %arg4[%c0_11, %c0_12, %c0_13, %c0_14] : memref<1x2x8x128xf32, #tpu.memory_space<vmem>>, vector<1x1x8x128xf32>
    %34 = vector.shape_cast %33 : vector<1x1x8x128xf32> to vector<8x128xf32>
    %35 = arith.addf %34, %29 : vector<8x128xf32>
    %c0_15 = arith.constant 0 : index
    %c0_16 = arith.constant 0 : index
    %c0_17 = arith.constant 0 : index
    %c0_18 = arith.constant 0 : index
    %36 = vector.load %arg4[%c0_15, %c0_16, %c0_17, %c0_18] : memref<1x2x8x128xf32, #tpu.memory_space<vmem>>, vector<1x1x8x128xf32>
    %37 = vector.shape_cast %36 : vector<1x1x8x128xf32> to vector<8x128xf32>
    %38 = vector.shape_cast %35 : vector<8x128xf32> to vector<1x1x8x128xf32>
    tpu.vector_store %arg4[%c0_15, %c0_16, %c0_17, %c0_18], %38 {strides = array<i32>} : memref<1x2x8x128xf32, #tpu.memory_space<vmem>>, vector<1x1x8x128xf32>,
    %c0_19 = arith.constant 0 : index
    %c1 = arith.constant 1 : index
    %c0_20 = arith.constant 0 : index
    %c0_21 = arith.constant 0 : index
    %39 = vector.load %arg4[%c0_19, %c1, %c0_20, %c0_21] : memref<1x2x8x128xf32, #tpu.memory_space<vmem>>, vector<1x1x8x128xf32>
    %40 = vector.shape_cast %39 : vector<1x1x8x128xf32> to vector<8x128xf32>
    %41 = arith.addf %40, %32 : vector<8x128xf32>
    %c0_22 = arith.constant 0 : index
    %c1_23 = arith.constant 1 : index
    %c0_24 = arith.constant 0 : index
    %c0_25 = arith.constant 0 : index
    %42 = vector.load %arg4[%c0_22, %c1_23, %c0_24, %c0_25] : memref<1x2x8x128xf32, #tpu.memory_space<vmem>>, vector<1x1x8x128xf32>
    %43 = vector.shape_cast %42 : vector<1x1x8x128xf32> to vector<8x128xf32>
    %44 = vector.shape_cast %41 : vector<8x128xf32> to vector<1x1x8x128xf32>
    tpu.vector_store %arg4[%c0_22, %c1_23, %c0_24, %c0_25], %44 {strides = array<i32>} : memref<1x2x8x128xf32, #tpu.memory_space<vmem>>, vector<1x1x8x128xf32>,
    return
  }
  func.func @transform_0(%arg0: i32, %arg1: i32) -> (i32, i32) {
    %c1_i32 = arith.constant 1 : i32
    %0 = arith.muli %arg0, %c1_i32 : i32
    %1 = arith.addi %0, %arg1 : i32
    %c0_i32 = arith.constant 0 : i32
    %c0_i32_0 = arith.constant 0 : i32
    return %1, %c0_i32 : i32, i32
  }
  func.func @transform_1(%arg0: i32, %arg1: i32) -> (i32, i32) {
    %c1_i32 = arith.constant 1 : i32
    %0 = arith.muli %arg0, %c1_i32 : i32
    %1 = arith.addi %0, %arg1 : i32
    %c0_i32 = arith.constant 0 : i32
    %c0_i32_0 = arith.constant 0 : i32
    return %1, %c0_i32 : i32, i32
  }
  func.func @transform_2(%arg0: i32, %arg1: i32) -> (i32, i32, i32, i32) {
    %c0_i32 = arith.constant 0 : i32
    %c0_i32_0 = arith.constant 0 : i32
    %c0_i32_1 = arith.constant 0 : i32
    %c0_i32_2 = arith.constant 0 : i32
    return %arg0, %c0_i32, %c0_i32_0, %c0_i32_1 : i32, i32, i32, i32
  }
}

</mosaic_0001>

<bundles_post_ra>
// kernel: tpu_custom_call.1
= control target key start
LH: loop header
LB: loop body
LE: loop exit
PB: predicated region body
PF: predicated region fallthrough
CT: control target
= control target key end

     0   :  { %7 = vsyncpa [#allocation3], 0  ;;  %s281_s0 = inlined_call_operand.hbm [shape: f32[16,128], index: 0, kind: input, shape index: {}]   ;;  %s282_s1 = inlined_call_operand.hbm [shape: f32[16,128], index: 1, kind: input, shape index: {}]   ;;  %s283_s2 = inlined_call_operand.hbm [shape: f32[1,2,8,128], index: 2, kind: output, shape index: {}]  }
   0x1   :  { %8 = vsyncpa [#allocation6], 0 }
   0x2   :  { %9 = vsyncpa [#allocation4], 0  ;;  %s209_s9 = smov [#allocation2]   ;;  %s137_s13 = scalar_lea.hbm %s281_s0, 256 }
   0x3   :  { %s19_s10 = sshll.u32 %s209_s9, 4  ;;  %p138_p0 = scmp.ne.s32.totalorder %s281_s0, %s137_s13  ;;  %s20_s10 = int_to_ptr.vmem [resolvable:$true] %s19_s10 }
   0x4   :  { %p141_p1 = scmp.lt.u32.totalorder %s137_s13, %s281_s0 }
   0x6   :  { %p143_p2 = pnand %p141_p1, %p138_p0 }
   0x8   :  { %146 = shalt.err (!%p143_p2)
}
   0x9   :  { %s147_s18 = scalar_lea.vmem %s20_s10, 256  ;;  %p152_p4 = scmp.lt.s32.totalorder %s20_s10, %s20_s10 }
   0xa   :  { %p148_p3 = scmp.ne.s32.totalorder %s20_s10, %s147_s18  ;;  %p153_p5 = scmp.lt.s32.totalorder %s147_s18, %s147_s18 }
   0xc   :  { %p154_p6 = por %p153_p5, %p152_p4 }
   0xe   :  { %p155_p7 = pnand %p154_p6, %p148_p3 }
  0x10   :  { %158 = shalt.err (!%p155_p7)
}
  0x11   :  { %s210_s19 = smov 128   ;;  %s211_s20 = smov 8  }
  0x12   :  { %25 = dma.hbm_to_vmem [thread:$0]  %s281_s0, 256, %s20_s10, [#allocation3], %s210_s19, %s210_s19, %s211_s20  }
  0x13   :  { %s212_s23 = smov [#allocation5]   ;;  %s159_s27 = scalar_lea.hbm %s282_s1, 256 }
  0x14   :  { %s35_s24 = sshll.u32 %s212_s23, 4  ;;  %p160_p8 = scmp.ne.s32.totalorder %s282_s1, %s159_s27  ;;  %s36_s24 = int_to_ptr.vmem [resolvable:$true] %s35_s24 }
  0x15   :  { %p163_p9 = scmp.lt.u32.totalorder %s159_s27, %s282_s1 }
  0x17   :  { %p165_p10 = pnand %p163_p9, %p160_p8 }
  0x19   :  { %168 = shalt.err (!%p165_p10)
}
  0x1a   :  { %s169_s4 = scalar_lea.vmem %s36_s24, 256  ;;  %p174_p12 = scmp.lt.s32.totalorder %s36_s24, %s36_s24 }
  0x1b   :  { %p170_p11 = scmp.ne.s32.totalorder %s36_s24, %s169_s4  ;;  %p175_p13 = scmp.lt.s32.totalorder %s169_s4, %s169_s4 }
  0x1d   :  { %p176_p0 = por %p175_p13, %p174_p12 }
  0x1f   :  { %p177_p1 = pnand %p176_p0, %p170_p11 }
  0x21   :  { %180 = shalt.err (!%p177_p1)
}
  0x22   :  { %41 = dma.hbm_to_vmem [thread:$0]  %s282_s1, 256, %s36_s24, [#allocation6], %s210_s19, %s210_s19, %s211_s20  }
  0x23   :  { %203 = dma.done.wait [#allocation3], 256  }
  0x24   :  { %204 = vsyncadd [#allocation3], 4294967040 }
  0x25   :  { %205 = dma.done.wait [#allocation6], 256  }
  0x26   :  { %206 = vsyncadd [#allocation6], 4294967040  ;;  %v58_v0 = vld [vmem:[#allocation2] sm:$0xff]  ;;  %v59_v1 = vld [vmem:[#allocation2 + $0x8] sm:$0xff]  ;;  %v213_v14 = vmov 0.0   ;;  %s214_s1 = smov [#allocation7]  }
  0x27   :  { %v60_v2 = vld [vmem:[#allocation5] sm:$0xff]  ;;  %v61_v3 = vld [vmem:[#allocation5 + $0x8] sm:$0xff]  ;;  %v64_v4 = vsub.f32 1.0, %v58_v0  ;;  %v65_v5 = vsub.f32 1.0, %v59_v1  ;;  %v74_v10 = vmul.f32 %v58_v0, %v58_v0  ;;  %v75_v11 = vmul.f32 %v59_v1, %v59_v1  ;;  %s112_s6 = sshll.u32 %s214_s1, 4  ;;  %s113_s6 = int_to_ptr.vmem [resolvable:$true] %s112_s6 }
  0x28   :  { %vm62_vm0 = vcmp.eq.f32.partialorder %v60_v2, 1.0  ;;  %vm63_vm1 = vcmp.eq.f32.partialorder %v61_v3, 1.0  ;;  %v76_v6 = vsub.f32 1.0, %v60_v2  ;;  %v77_v7 = vsub.f32 1.0, %v61_v3  ;;  %s181_s7 = scalar_lea.vmem %s113_s6, 256  ;;  %p186_p3 = scmp.lt.s32.totalorder %s113_s6, %s113_s6 }
  0x29   :  { %v66_v8 = vsel %vm62_vm0, %v58_v0, %v64_v4  ;;  %v67_v9 = vsel %vm63_vm1, %v59_v1, %v65_v5  ;;  %v125_v15 = vsel %vm62_vm0, 1.0, %v213_v14  ;;  %v126_v16 = vsel %vm63_vm1, 1.0, %v213_v14  ;;  %p182_p2 = scmp.ne.s32.totalorder %s113_s6, %s181_s7  ;;  %p187_p4 = scmp.lt.s32.totalorder %s181_s7, %s181_s7 }
  0x2a   :  { %133 = vlog2.f32 %v66_v8  ;;  %v78_v12 = vmul.f32 %v76_v6, %v76_v6  ;;  %v79_v13 = vmul.f32 %v77_v7, %v77_v7  ;;  %v98_v19 = vadd.f32 %v126_v16, %v125_v15 }
  0x2b   :  { %135 = vlog2.f32 %v67_v9  ;;  %vm84_vm2 = vcmp.lt.f32.partialorder %v60_v2, 1.0  ;;  %vm85_vm3 = vcmp.lt.f32.partialorder %v61_v3, 1.0  ;;  %v72_v22 = vmul.f32 %v64_v4, %v64_v4  ;;  %p188_p5 = por %p187_p4, %p186_p3 }
  0x2c   :  { %v80_v17 = vmul.f32 %v78_v12, %v78_v12  ;;  %v81_v18 = vmul.f32 %v79_v13, %v79_v13  ;;  %106 = vst [vmem:[#allocation7 + $0x8] sm:$0xff] %v98_v19  ;;  %v73_v23 = vmul.f32 %v65_v5, %v65_v5 }
  0x2d   :  { %p189_p6 = pnand %p188_p5, %p182_p2 }
  0x2e   :  { %v82_v20 = vmul.f32 %v80_v17, %v74_v10  ;;  %v83_v21 = vmul.f32 %v81_v18, %v75_v11 }
  0x30   :  { %v86_v24 = vsel %vm84_vm2, %v82_v20, 0.0  ;;  %v87_v25 = vsel %vm85_vm3, %v83_v21, 0.0 }
  0x31   :  { %v88_v27 = vsel %vm62_vm0, %v72_v22, %v86_v24  ;;  %v89_v30 = vsel %vm63_vm1, %v73_v23, %v87_v25 }
  0x34   :  { %v134_v26 = vpop.eup %133 }
  0x35   :  { %v136_v28 = vpop.eup %135  ;;  %v69_v29 = vmul.f32 0.6931472, %v134_v26 }
  0x36   :  { %v71_v31 = vmul.f32 0.6931472, %v136_v28 }
  0x37   :  { %v90_v32 = vmul.f32 %v88_v27, %v69_v29 }
  0x38   :  { %v91_v33 = vmul.f32 %v89_v30, %v71_v31 }
  0x3a   :  { %v96_v34 = vadd.f32 %v91_v33, %v90_v32 }
  0x3c   :  { %102 = vst [vmem:[#allocation7] sm:$0xff] %v96_v34 }
  0x3d   :  { %192 = shalt.err (!%p189_p6)
}
  0x3e   :  { %s193_s10 = scalar_lea.hbm %s283_s2, 256 }
  0x3f   :  { %p194_p7 = scmp.ne.s32.totalorder %s283_s2, %s193_s10  ;;  %p197_p8 = scmp.lt.u32.totalorder %s193_s10, %s283_s2 }
  0x41   :  { %p199_p9 = pnand %p197_p8, %p194_p7 }
  0x43   :  { %202 = shalt.err (!%p199_p9)
}
  0x44   :  { %118 = dma.vmem_to_hbm [thread:$0]  %s113_s6, 256, %s283_s2, [#allocation4], %s210_s19, %s210_s19, %s211_s20  }
  0x45   :  { %207 = dma.done.wait [#allocation4], 256  }
  0x46   :  { %208 = vsyncadd [#allocation4], 4294967040 }
  0x47   :  { %122 = vsyncpa [#allocation3], 1 }
  0x48   :  { %123 = vsyncpa [#allocation6], 1 }
  0x49   :  { %124 = vsyncpa [#allocation4], 1 }

</bundles_post_ra>
